<compile_context>
chip_gen: v7x
topology: tpu7x:2x2x1
jax: 0.10.0
libtpu: 0.0.40
codegen_flags: <defaults>
</compile_context>

<pallas_src>
import functools

import jax
import jax.numpy as jnp
import numpy as np
from jax.experimental import pallas as pl
from jax.experimental.pallas import tpu as pltpu


# ----------------------------- Pallas kernel ------------------------------- #

def _layernorm_kernel(*refs, eps, has_bias):
    if has_bias:
        x_ref, w_ref, b_ref, o_ref = refs
    else:
        x_ref, w_ref, o_ref = refs
        b_ref = None

    # x_ref: (TM, H) native dtype   w_ref/b_ref: (1, H) fp32   o_ref: (TM, H)
    h = x_ref.shape[-1]
    inv_h = 1.0 / float(h)

    xf = x_ref[...].astype(jnp.float32)
    # Single pass over the tile: sum and sum-of-squares (2 XLU reductions total).
    s = jnp.sum(xf, axis=-1, keepdims=True)                    # (TM, 1)
    s2 = jnp.sum(xf * xf, axis=-1, keepdims=True)              # (TM, 1)
    mean = s * inv_h
    var = jnp.maximum(s2 * inv_h - mean * mean, 0.0)           # guard cancellation
    inv = jax.lax.rsqrt(var + eps)                             # EUP rsqrt (free slot)

    y = (xf - mean) * inv * w_ref[...]                         # weight already fp32
    if b_ref is not None:
        y = y + b_ref[...]

    o_ref[...] = y.astype(o_ref.dtype)                         # lane-dense full-H store


# ----------------------------- wrapper -------------------------------------- #

def fast_layer_norm(hidden_states, normalized_shape, weight, bias=None, eps=1e-5,
                    *, block_rows=None):
    """LayerNorm over the trailing `normalized_shape` dims, affine weight + optional bias."""
    if isinstance(normalized_shape, int):
        normalized_shape = (normalized_shape,)
    normalized_shape = tuple(int(d) for d in normalized_shape)
    H = int(np.prod(normalized_shape))

    orig_shape = hidden_states.shape
    n_lead = len(orig_shape) - len(normalized_shape)
    assert n_lead >= 0 and tuple(orig_shape[n_lead:]) == normalized_shape, (
        "normalized_shape must match the trailing dims of hidden_states")
    N = int(np.prod(orig_shape[:n_lead])) if n_lead > 0 else 1

    x2d = hidden_states.reshape(N, H)
    # weight/bias are resident (block pinned to (0,0)): pre-cast to fp32 once so the
    # kernel has no per-iteration VALU cast; extra HBM bytes are negligible.
    w2d = weight.reshape(1, H).astype(jnp.float32)
    b2d = bias.reshape(1, H).astype(jnp.float32) if bias is not None else None
    has_bias = b2d is not None

    itemsize = int(jnp.dtype(hidden_states.dtype).itemsize)
    row_bytes = H * itemsize

    if block_rows is None:
        # Target ~8 MiB of native-dtype data per block (HBM-roofline friendly on
        # v5e/v6e/v7x), multiple of 8 sublanes.
        target_bytes = 8 * 1024 * 1024
        block_rows = max(8, (target_bytes // row_bytes // 8) * 8)
    # Keep 2x(in+out) double-buffering within a conservative VMEM budget
    # (~40 MiB), safe on v7x's 64 MiB per-TC VMEM.
    max_tile_bytes = 10 * 1024 * 1024
    block_rows = min(block_rows, max(8, (max_tile_bytes // row_bytes // 8) * 8))
    # v7x megacore: make sure the row grid has >= ~4 blocks (when N allows) so
    # both TensorCores get balanced work; also never exceed the row count.
    quarter = max(8, ((pl.cdiv(N, 4) + 7) // 8) * 8)
    block_rows = min(block_rows, quarter)
    block_rows = max(8, block_rows)

    grid = (pl.cdiv(N, block_rows),)   # ragged last block: Pallas masks the store

    # VMEM limit from the real double-buffered footprint + slack (don't ask for
    # all of v7x's 64 MiB).
    tile_bytes = block_rows * row_bytes
    param_bytes = (1 + int(has_bias)) * H * 4
    footprint = 2 * (tile_bytes + tile_bytes) + 2 * param_bytes
    vmem_limit = max(16 * 1024 * 1024, footprint + 8 * 1024 * 1024)

    kernel = functools.partial(_layernorm_kernel, eps=float(eps), has_bias=has_bias)

    in_specs = [
        pl.BlockSpec((block_rows, H), lambda i: (i, 0)),     # x rows
        pl.BlockSpec((1, H), lambda i: (0, 0)),              # weight (resident)
    ]
    inputs = [x2d, w2d]
    if has_bias:
        in_specs.append(pl.BlockSpec((1, H), lambda i: (0, 0)))
        inputs.append(b2d)

    out = pl.pallas_call(
        kernel,
        out_shape=jax.ShapeDtypeStruct((N, H), hidden_states.dtype),
        grid=grid,
        in_specs=in_specs,
        out_specs=pl.BlockSpec((block_rows, H), lambda i: (i, 0)),
        compiler_params=pltpu.CompilerParams(
            dimension_semantics=("parallel",),               # v7x: both TCs share rows
            vmem_limit_bytes=int(vmem_limit)),
    )(*inputs)

    return out.reshape(orig_shape)


class FastLayerNorm:
    """Drop-in analogue of ipex.llm.modules.FastLayerNorm (forward only)."""

    def __init__(self, normalized_shape, eps, weight, bias=None):
        self.normalized_shape = normalized_shape
        self.eps = eps
        self.weight = weight
        self.bias = bias

    def forward(self, hidden_states):
        return fast_layer_norm(hidden_states, self.normalized_shape,
                               self.weight, self.bias, self.eps)

    __call__ = forward

    @classmethod
    def apply_function(cls, hidden_states, normalized_shape, weight, bias, eps):
        return fast_layer_norm(hidden_states, normalized_shape, weight, bias, eps)


# ----------------------------- reference & demo ----------------------------- #

def _reference(x, w, b, eps):
    xf = x.astype(jnp.float32)
    mean = jnp.mean(xf, axis=-1, keepdims=True)
    var = jnp.mean((xf - mean) ** 2, axis=-1, keepdims=True)
    y = (xf - mean) * jax.lax.rsqrt(var + eps)
    y = y * w.astype(jnp.float32)
    if b is not None:
        y = y + b.astype(jnp.float32)
    return y.astype(x.dtype)


if __name__ == "__main__":
    root = jax.random.PRNGKey(0)

    # case 1: typical (batch, seq, hidden) with bias
    batch, seq, hidden = 2, 8, 512
    eps = 1e-5
    k1, k2, k3, k4 = jax.random.split(root, 4)
    x = jax.random.normal(k1, (batch, seq, hidden), jnp.float32)
    weight = 1.0 + 0.1 * jax.random.normal(k2, (hidden,), jnp.float32)
    bias = 0.1 * jax.random.normal(k3, (hidden,), jnp.float32)

    ln = FastLayerNorm(hidden, eps, weight, bias)
    out = jax.block_until_ready(ln(x))
    ref = _reference(x, weight, bias, eps)
    np.testing.assert_allclose(np.asarray(out), np.asarray(ref), rtol=2e-5, atol=2e-5)
    assert out.shape == x.shape

    # case 2: no bias, row count not a multiple of the tile (exercises the masked
    # ragged last block — no padding / slicing in the wrapper)
    batch2, seq2, hidden2 = 3, 7, 256
    x2 = jax.random.normal(k4, (batch2, seq2, hidden2), jnp.float32)
    w2 = 1.0 + 0.1 * jax.random.normal(k2, (hidden2,), jnp.float32)
    out2 = jax.block_until_ready(
        FastLayerNorm.apply_function(x2, hidden2, w2, None, eps))
    ref2 = _reference(x2, w2, None, eps)
    np.testing.assert_allclose(np.asarray(out2), np.asarray(ref2), rtol=2e-5, atol=2e-5)
    assert out2.shape == x2.shape

    # TODO(synk): IPEX's runtime device-dispatch (IPEXRuntimeCustomOps) has no Pallas
    # equivalent; this implementation always runs the TPU Pallas path.
    print("KERNEL_OK")
</pallas_src>

<mosaic_0001>
module attributes {stable_mosaic.version = 11 : i64} {
  func.func @_layernorm_kernel(%arg0: i32, %arg1: memref<8x512xf32, #tpu.memory_space<vmem>>, %arg2: memref<1x512xf32, #tpu.memory_space<vmem>>, %arg3: memref<1x512xf32, #tpu.memory_space<vmem>>, %arg4: memref<8x512xf32, #tpu.memory_space<vmem>>) attributes {dimension_semantics = [#tpu.dimension_semantics<parallel>], iteration_bounds = array<i64: 2>, scalar_prefetch = 0 : i64, scratch_operands = 0 : i64, tpu.core_type = #tpu.core_type<tc>, window_params = [{transform_indices = @transform_0, window_bounds = array<i64: 8, 512>}, {pipeline_mode = #tpu.pipeline_mode<synchronous>, transform_indices = @transform_1, window_bounds = array<i64: 1, 512>}, {pipeline_mode = #tpu.pipeline_mode<synchronous>, transform_indices = @transform_2, window_bounds = array<i64: 1, 512>}, {transform_indices = @transform_3, window_bounds = array<i64: 8, 512>}]} {
    %c0 = arith.constant 0 : index
    %c0_0 = arith.constant 0 : index
    %0 = vector.load %arg1[%c0, %c0_0] : memref<8x512xf32, #tpu.memory_space<vmem>>, vector<8x512xf32>
    %cst = arith.constant dense<0.000000e+00> : vector<8xf32>
    %1 = vector.multi_reduction <add>, %0, %cst [1] : vector<8x512xf32> to vector<8xf32>
    %2 = vector.shape_cast %1 : vector<8xf32> to vector<8x1xf32>
    %3 = arith.mulf %0, %0 : vector<8x512xf32>
    %cst_1 = arith.constant dense<0.000000e+00> : vector<8xf32>
    %4 = vector.multi_reduction <add>, %3, %cst_1 [1] : vector<8x512xf32> to vector<8xf32>
    %5 = vector.shape_cast %4 : vector<8xf32> to vector<8x1xf32>
    %cst_2 = arith.constant 0.001953125 : f32
    %6 = vector.broadcast %cst_2 : f32 to vector<8x1xf32>
    %7 = arith.mulf %2, %6 : vector<8x1xf32>
    %cst_3 = arith.constant 0.001953125 : f32
    %8 = vector.broadcast %cst_3 : f32 to vector<8x1xf32>
    %9 = arith.mulf %5, %8 : vector<8x1xf32>
    %10 = arith.mulf %7, %7 : vector<8x1xf32>
    %11 = arith.subf %9, %10 : vector<8x1xf32>
    %cst_4 = arith.constant 0.000000e+00 : f32
    %12 = vector.broadcast %cst_4 : f32 to vector<8x1xf32>
    %13 = arith.maximumf %11, %12 : vector<8x1xf32>
    %cst_5 = arith.constant 9.99999974E-6 : f32
    %14 = vector.broadcast %cst_5 : f32 to vector<8x1xf32>
    %15 = arith.addf %13, %14 : vector<8x1xf32>
    %16 = math.rsqrt %15 : vector<8x1xf32>
    %17 = vector.broadcast %7 : vector<8x1xf32> to vector<8x512xf32>
    %18 = arith.subf %0, %17 : vector<8x512xf32>
    %19 = vector.broadcast %16 : vector<8x1xf32> to vector<8x512xf32>
    %20 = arith.mulf %18, %19 : vector<8x512xf32>
    %c0_6 = arith.constant 0 : index
    %c0_7 = arith.constant 0 : index
    %21 = vector.load %arg2[%c0_6, %c0_7] : memref<1x512xf32, #tpu.memory_space<vmem>>, vector<1x512xf32>
    %22 = vector.broadcast %21 : vector<1x512xf32> to vector<8x512xf32>
    %23 = arith.mulf %20, %22 : vector<8x512xf32>
    %c0_8 = arith.constant 0 : index
    %c0_9 = arith.constant 0 : index
    %24 = vector.load %arg3[%c0_8, %c0_9] : memref<1x512xf32, #tpu.memory_space<vmem>>, vector<1x512xf32>
    %25 = vector.broadcast %24 : vector<1x512xf32> to vector<8x512xf32>
    %26 = arith.addf %23, %25 : vector<8x512xf32>
    %c0_10 = arith.constant 0 : index
    %c0_11 = arith.constant 0 : index
    %27 = vector.load %arg4[%c0_10, %c0_11] : memref<8x512xf32, #tpu.memory_space<vmem>>, vector<8x512xf32>
    tpu.vector_store %arg4[%c0_10, %c0_11], %26 {strides = array<i32>} : memref<8x512xf32, #tpu.memory_space<vmem>>, vector<8x512xf32>,
    return
  }
  func.func @transform_0(%arg0: i32) -> (i32, i32) {
    %c0_i32 = arith.constant 0 : i32
    %c0_i32_0 = arith.constant 0 : i32
    return %arg0, %c0_i32 : i32, i32
  }
  func.func @transform_1(%arg0: i32) -> (i32, i32) {
    %c0_i32 = arith.constant 0 : i32
    %c0_i32_0 = arith.constant 0 : i32
    %c0_i32_1 = arith.constant 0 : i32
    return %c0_i32, %c0_i32_0 : i32, i32
  }
  func.func @transform_2(%arg0: i32) -> (i32, i32) {
    %c0_i32 = arith.constant 0 : i32
    %c0_i32_0 = arith.constant 0 : i32
    %c0_i32_1 = arith.constant 0 : i32
    return %c0_i32, %c0_i32_0 : i32, i32
  }
  func.func @transform_3(%arg0: i32) -> (i32, i32) {
    %c0_i32 = arith.constant 0 : i32
    %c0_i32_0 = arith.constant 0 : i32
    return %arg0, %c0_i32 : i32, i32
  }
}

</mosaic_0001>

<bundles_post_ra>
// kernel: tpu_custom_call.1
= control target key start
LH: loop header
LB: loop body
LE: loop exit
PB: predicated region body
PF: predicated region fallthrough
CT: control target
= control target key end

     0   :  { %8 = vsyncpa [#allocation3], 0  ;;  %s822_s0 = inlined_call_operand.hbm [shape: f32[16,512], index: 0, kind: input, shape index: {}]   ;;  %s823_s1 = inlined_call_operand.hbm [shape: f32[1,512], index: 1, kind: input, shape index: {}]   ;;  %s824_s2 = inlined_call_operand.vmem [shape: f32[1,512], index: 2, kind: input, shape index: {}]   ;;  %s825_s3 = inlined_call_operand.hbm [shape: f32[16,512], index: 3, kind: output, shape index: {}]  }
   0x1   :  { %10 = vsyncpa [#allocation3 + $0x1], 0 }
   0x2   :  { %11 = vsyncpa [#allocation6], 0 }
   0x3   :  { %12 = vsyncpa [#allocation4], 0 }
   0x4   :  { %14 = vsyncpa [#allocation4 + $0x1], 0  ;;  %s614_s12 = smov 0   ;;  %s616_s13 = smov 0  }
   0x5   :  { %s618_s14 = smov 0   ;;  %s620_s15 = smov 0  }
   0x6 LB: > { %s635_s16 = sadd.s32 4294967295, %s589_s15   ;;  %s384_s17 = sadd.s32 4294967294, %s589_s15   ;;  %s589_s15 = sphi %s620_s15, %s849_s15   ;;  %s585_s14 = sphi %s618_s14, %s848_s14   ;;  %s581_s13 = sphi %s616_s13, %s847_s13   ;;  %s577_s12 = sphi %s614_s12, %s846_s12  }
   0x7   : > { %p40_p0 = scmp.ne.s32.totalorder %s581_s13, %s577_s12  ;;  %p826_p1 = scmp.eq.s32.totalorder %s635_s16, 0 }
   0x8   : > { %p112_p3 = scmp.eq.s32.totalorder %s384_s17, 1  ;;  %p385_p5 = scmp.ge.s32.totalorder %s589_s15, 1 }
   0x9   : > { %p644_p4 = por %p826_p1, %p40_p0  ;;  %p119_p7 = scmp.lt.s32.totalorder %s589_s15, 3 }
   0xa   : > { %p649_p6 = por %p112_p3, %p40_p0  ;;  %s591_s21 = smov [#allocation5]  }
   0xb   : > { %s829_s18 = scalar_select %p644_p4, 1, 0 }
   0xc   : > { %s830_s19 = scalar_select %p649_p6, 1, 0 }
   0xd   : > { %p654_p8 = pnand %p385_p5, %p119_p7  ;;  %s132_s22 = sshll.u32 %s591_s21, 4  ;;  %s133_s22 = int_to_ptr.vmem [resolvable:$true] %s132_s22 }
   0xe   : > { %s662_s23 = sadd.s32 1, %s589_s15   ;;  %s27_s27 = sadd.s32 1, %s585_s14 }
   0xf   : > { %s831_s20 = scalar_select %p654_p8, 1, 0 }
  0x10   : > { %p410_p10 = pneg %p654_p8  ;;  %s24_s25 = ssub.s32 %s589_s15, %s662_s23 }
  0x11   : > { %p672_p12 = scmp.eq.s32.totalorder %s24_s25, 0  ;;  %s461_s30 = scalar_lea.hbm %s823_s1, 64 }
  0x12   : > { %p666_p11 = pnand %p410_p10, %p826_p1  ;;  %p462_p0 = scmp.ne.s32.totalorder %s823_s1, %s461_s30 }
  0x13   : > { %s833_s26 = scalar_select %p672_p12, 1, 0 }
  0x14   : > { %p463_p3 = pneg %p666_p11  ;;  %p468_p10 = scmp.lt.u32.totalorder %s461_s30, %s823_s1 }
  0x16   : > { %p464_p5 = pnand %p463_p3, %p462_p0 }
  0x18   : > { %p465_p7 = pneg %p464_p5 }
  0x1a   : > { %p470_p9 = pnand %p468_p10, %p465_p7 }
  0x1c   : > { %473 = shalt.err (!%p470_p9)
}
  0x1d   : > { %s474_s8 = scalar_lea.vmem %s133_s22, 64  ;;  %p482_p6 = scmp.lt.s32.totalorder %s133_s22, %s133_s22 }
  0x1e   : > { %p475_p1 = scmp.ne.s32.totalorder %s133_s22, %s474_s8  ;;  %p483_p4 = scmp.lt.s32.totalorder %s474_s8, %s474_s8 }
  0x20   : > { %p477_p2 = pnand %p475_p1, %p463_p3  ;;  %p484_p8 = por %p483_p4, %p482_p6 }
  0x22   : > { %p478_p13 = pneg %p477_p2 }
  0x24   : > { %p485_p12 = pnand %p484_p8, %p478_p13 }
  0x26   : > { %488 = shalt.err (!%p485_p12)
}
  0x27   : > { %413 = dma.hbm_to_vmem [thread:$0]  (!%p666_p11), %s823_s1, 64, %s133_s22, [#allocation6]  }
  0x28   : > { %p834_p1 = scmp.ne.s32.totalorder %s833_s26, 0  ;;  %p35_p2 = scmp.eq.s32.totalorder %s589_s15, 0 }
  0x29   : > { %p835_p4 = scmp.ne.s32.totalorder %s585_s14, %s581_s13  ;;  %p836_p6 = scmp.eq.s32.totalorder %s635_s16, 1 }
  0x2a   : > { %s698_s11 = scalar_select %p834_p1, %s585_s14, %s27_s27  }
  0x2b   : > { %p706_p8 = por %p836_p6, %p835_p4  ;;  %p423_p9 = scmp.lt.s32.totalorder %s589_s15, 2 }
  0x2c   : > { %s146_s21 = sand.u32 1, %s585_s14   ;;  %p838_p12 = pmov %p835_p4 }
  0x2d   : > { %s388_s24 = sshll.u32 %s146_s21, 5  ;;  %s400_s25 = sshll.u32 %s589_s15, 9 }
  0x2e   : > { %p36_p13 = por %p35_p2, %p838_p12  ;;  %s719_s22 = scalar_lea.hbm %s822_s0, %s400_s25 }
  0x2f   : > { %s150_s26 = scalar_lea.vmem [#allocation2], %s388_s24  ;;  %s147_s4 = scalar_lea.sflag [#allocation3], %s146_s21 }
  0x30   : > { %s158_s27 = sshll.u32 %s150_s26, 4  ;;  %p721_p11 = pnand %p423_p9, %p36_p13  ;;  %s725_s27 = int_to_ptr.vmem [resolvable:$true] %s158_s27 }
  0x31   : > { %s489_s5 = scalar_lea.hbm %s719_s22, 512  ;;  %s494_s8 = scalar_lea.hbm %s822_s0, 1024 }
  0x32   : > { %p490_p0 = scmp.ne.s32.totalorder %s719_s22, %s489_s5  ;;  %p491_p3 = pneg %p721_p11 }
  0x33   : > { %p495_p10 = scmp.lt.u32.totalorder %s719_s22, %s822_s0  ;;  %p496_p1 = scmp.lt.u32.totalorder %s494_s8, %s489_s5 }
  0x34   : > { %p492_p5 = pnand %p491_p3, %p490_p0  ;;  %p498_p4 = scmp.lt.u32.totalorder %s489_s5, %s719_s22 }
  0x35   : > { %p497_p2 = por %p496_p1, %p495_p10 }
  0x36   : > { %p493_p7 = pneg %p492_p5 }
  0x37   : > { %p499_p6 = por %p498_p4, %p497_p2 }
  0x39   : > { %p500_p9 = pnand %p499_p6, %p493_p7 }
  0x3b   : > { %503 = shalt.err (!%p500_p9)
}
  0x3c   : > { %s504_s21 = scalar_lea.vmem %s725_s27, 512  ;;  %s592_s24 = smov [#allocation2]  }
  0x3d   : > { %p505_p12 = scmp.ne.s32.totalorder %s725_s27, %s504_s21  ;;  %s509_s25 = sshll.u32 %s592_s24, 4  ;;  %s510_s25 = int_to_ptr.vmem [resolvable:$false] %s509_s25 }
  0x3e   : > { %s511_s28 = scalar_lea.vmem %s510_s25, 1024  ;;  %p512_p5 = scmp.lt.s32.totalorder %s725_s27, %s510_s25 }
  0x3f   : > { %p507_p13 = pnand %p505_p12, %p491_p3  ;;  %p513_p10 = scmp.lt.s32.totalorder %s511_s28, %s504_s21 }
  0x41   : > { %p508_p0 = pneg %p507_p13  ;;  %p514_p1 = por %p513_p10, %p512_p5 }
  0x43   : > { %p515_p2 = pnand %p514_p1, %p508_p0 }
  0x45   : > { %518 = shalt.err (!%p515_p2)
}
  0x46   : > { %417 = dma.hbm_to_vmem [thread:$0]  (!%p721_p11), %s719_s22, 512, %s725_s27, %s147_s4  }
  0x47   : > { %p840_p7 = scmp.ne.s32.totalorder %s831_s20, 0 }
  0x48   : > { %s755_s29 = sand.u32 (!%p840_p7), 1, %s581_s13   ;;  %p841_p3 = scmp.ne.s32.totalorder (!%p840_p7), %s829_s18, 0 }
  0x49   : > { %167 = sbr.rel (%p840_p7) target bundleno = 277 (0x115), region = 32  ;;  %s392_s26 = sshll.u32 (!%p840_p7), %s755_s29, 5 }
  0x4a   : > { %s170_s5 = scalar_lea.sflag (!%p840_p7), [#allocation3], %s755_s29  ;;  %s173_s6 = scalar_lea.vmem (!%p840_p7), [#allocation2], %s392_s26 }
  0x50   : > { %564 = dma.done.wait (%p841_p3), %s170_s5, 512  }
  0x51   : > { %566 = vsyncadd (%p841_p3), %s170_s5, 4294966784  ;;  %p842_p11 = scmp.eq.s32.totalorder %s635_s16, 0 }
  0x53   : > { %568 = dma.done.wait (%p842_p11), [#allocation6], 64   ;;  %p843_p4 = pmov %p842_p11 }
  0x54   : > { %v200_v0 = vld [vmem:[%s173_s6] sm:$0xff]  ;;  %v201_v1 = vld [vmem:[%s173_s6 + $0x8] sm:$0xff]  ;;  %v202_v2 = vld [vmem:[%s173_s6 + $0x10] sm:$0xff]  ;;  %v235_v21 = vlaneseq  ;;  %s401_s22 = sshll.u32 %s635_s16, 9  ;;  %s199_s27 = scalar_lea.vmem [#allocation7], %s392_s26 }
  0x55   : > { %570 = vsyncadd (%p843_p4), [#allocation6], 4294967232  ;;  %v204_v3 = vadd.f32 %v201_v1, %v200_v0  ;;  %v209_v4 = vmul.f32 %v200_v0, %v200_v0  ;;  %v210_v5 = vmul.f32 %v201_v1, %v201_v1  ;;  %v211_v6 = vmul.f32 %v202_v2, %v202_v2  ;;  %v203_v7 = vld [vmem:[%s173_s6 + $0x18] sm:$0xff]  ;;  %v233_v28 = vld [vmem:[#allocation5] sm:$0xf]  ;;  %s304_s30 = sshll.u32 %s199_s27, 4  ;;  %s778_s8 = scalar_lea.hbm %s825_s3, %s401_s22  ;;  %s780_s30 = int_to_ptr.vmem [resolvable:$true] %s304_s30 }
  0x56   : > { %v212_v9 = vmul.f32 %v203_v7, %v203_v7  ;;  %v236_v23 = vshrl.u32 %v235_v21, 7  ;;  %v259_v29 = vld [vmem:[%s824_s2] sm:$0xf]  ;;  %s290_s16 = scalar_lea.sflag [#allocation4], %s755_s29  ;;  %s519_s9 = scalar_lea.vmem %s780_s30, 512 }
  0x57   : > { %v205_v8 = vadd.f32 %v204_v3, %v202_v2  ;;  %v213_v10 = vadd.f32 %v210_v5, %v209_v4  ;;  %p520_p6 = scmp.ne.s32.totalorder %s780_s30, %s519_s9  ;;  %s593_s10 = smov [#allocation7]  }
  0x58   : > { %v237_v24 = vsub.s32 0, %v236_v23  ;;  %v241_v25 = vsub.s32 1, %v236_v23  ;;  %v245_v26 = vsub.s32 2, %v236_v23  ;;  %v249_v27 = vsub.s32 3, %v236_v23  ;;  %s523_s21 = sshll.u32 %s593_s10, 4  ;;  %s524_s21 = int_to_ptr.vmem [resolvable:$false] %s523_s21 }
  0x59   : > { %v206_v11 = vadd.f32 %v205_v8, %v203_v7  ;;  %v214_v12 = vadd.f32 %v213_v10, %v211_v6  ;;  %p521_p9 = pnand %p520_p6, %p706_p8  ;;  %s525_s24 = scalar_lea.vmem %s524_s21, 1024 }
  0x5a   : > { %v238_v30 = vrot.slane %v233_v28, %v237_v24  ;;  %v242_v31 = vrot.slane %v233_v28, %v241_v25  ;;  %v246_v32 = vrot.slane %v233_v28, %v245_v26  ;;  %v250_v33 = vrot.slane %v233_v28, %v249_v27  ;;  %p526_p13 = scmp.lt.s32.totalorder %s780_s30, %s524_s21  ;;  %p527_p0 = scmp.lt.s32.totalorder %s525_s24, %s519_s9 }
  0x5b   : > { %207 = vadd.xlane.f32.xlu0 %v206_v11  ;;  %v215_v13 = vadd.f32 %v214_v12, %v212_v9  ;;  %v264_v39 = vrot.slane %v259_v29, %v237_v24  ;;  %v268_v40 = vrot.slane %v259_v29, %v241_v25  ;;  %v272_v41 = vrot.slane %v259_v29, %v245_v26  ;;  %p522_p12 = pneg %p521_p9 }
  0x5c   : > { %v276_v42 = vrot.slane %v259_v29, %v249_v27  ;;  %p528_p5 = por %p527_p0, %p526_p13 }
  0x5e   : > { %p529_p10 = pnand %p528_p5, %p522_p12 }
  0x5f   : > { %216 = vadd.xlane.f32.xlu0 %v215_v13 }
  0xe8   : > { %v208_v14 = vpop.xlane.xlu0 %207 }
  0xe9   : > { %v218_v15 = vmul.f32 0.001953125, %v208_v14 }
  0xeb   : > { %v220_v17 = vmul.f32 %v218_v15, %v218_v15  ;;  %v225_v34 = vsub.f32 %v200_v0, %v218_v15  ;;  %v226_v35 = vsub.f32 %v201_v1, %v218_v15  ;;  %v227_v36 = vsub.f32 %v202_v2, %v218_v15 }
  0xec   : > { %v217_v16 = vpop.xlane.xlu0 %216  ;;  %v228_v37 = vsub.f32 %v203_v7, %v218_v15 }
  0xed   : > { %v219_v18 = vmul.f32 0.001953125, %v217_v16 }
  0xef   : > { %v221_v19 = vsub.f32 %v219_v18, %v220_v17 }
  0xf1   : > { %v222_v20 = vmax.f32 %v221_v19, 0.0 }
  0xf3   : > { %v223_v22 = vadd.f32 1e-05, %v222_v20 }
  0xf5   : > { %459 = vrsqrt.f32 %v223_v22 }
  0xff   : > { %v460_v38 = vpop.eup %459 }
 0x100   : > { %v229_v43 = vmul.f32 %v460_v38, %v225_v34  ;;  %v230_v44 = vmul.f32 %v460_v38, %v226_v35  ;;  %v231_v45 = vmul.f32 %v460_v38, %v227_v36  ;;  %v232_v46 = vmul.f32 %v460_v38, %v228_v37 }
 0x102   : > { %v255_v47 = vmul.f32 %v238_v30, %v229_v43  ;;  %v256_v48 = vmul.f32 %v242_v31, %v230_v44  ;;  %v257_v49 = vmul.f32 %v246_v32, %v231_v45  ;;  %v258_v50 = vmul.f32 %v250_v33, %v232_v46 }
 0x104   : > { %v281_v51 = vadd.f32 %v264_v39, %v255_v47  ;;  %v282_v52 = vadd.f32 %v268_v40, %v256_v48  ;;  %v283_v53 = vadd.f32 %v272_v41, %v257_v49  ;;  %v284_v54 = vadd.f32 %v276_v42, %v258_v50 }
 0x106   : > { %285 = vst [vmem:[%s199_s27] sm:$0xff] %v281_v51  ;;  %286 = vst [vmem:[%s199_s27 + $0x8] sm:$0xff] %v282_v52 }
 0x107   : > { %287 = vst [vmem:[%s199_s27 + $0x10] sm:$0xff] %v283_v53  ;;  %288 = vst [vmem:[%s199_s27 + $0x18] sm:$0xff] %v284_v54 }
 0x108   : > { %532 = shalt.err (!%p529_p10)
}
 0x109   : > { %s533_s25 = scalar_lea.hbm %s778_s8, 512  ;;  %s537_s26 = scalar_lea.hbm %s825_s3, 1024 }
 0x10a   : > { %p534_p1 = scmp.ne.s32.totalorder %s778_s8, %s533_s25  ;;  %p538_p3 = scmp.lt.u32.totalorder %s778_s8, %s825_s3 }
 0x10b   : > { %p539_p11 = scmp.lt.u32.totalorder %s537_s26, %s533_s25  ;;  %p541_p6 = scmp.lt.u32.totalorder %s533_s25, %s778_s8 }
 0x10c   : > { %p535_p2 = pnand %p534_p1, %p706_p8 }
 0x10d   : > { %p540_p4 = por %p539_p11, %p538_p3 }
 0x10e   : > { %p536_p7 = pneg %p535_p2 }
 0x10f   : > { %p542_p9 = por %p541_p6, %p540_p4 }
 0x111   : > { %p543_p12 = pnand %p542_p9, %p536_p7 }
 0x113   : > { %546 = shalt.err (!%p543_p12)
}
 0x114   : > { %408 = dma.vmem_to_hbm [thread:$0]  (%p706_p8), %s780_s30, 512, %s778_s8, %s290_s16  }
 0x115 PF: > { %s316_s18 = sand.u32 1, %s577_s12   ;;  %p844_p13 = scmp.ne.s32.totalorder %s830_s19, 0 }
 0x116   : > { %p845_p0 = scmp.ge.s32.totalorder %s589_s15, 2  ;;  %s317_s20 = scalar_lea.sflag [#allocation4], %s316_s18 }
 0x118   : > { %p419_p5 = pnand %p845_p0, %p844_p13 }
 0x11a   : > { %572 = dma.done.wait (!%p419_p5), %s317_s20, 512  }
 0x11b   : > { %574 = vsyncadd (!%p419_p5), %s317_s20, 4294966784  ;;  %p17_p10 = scmp.ge.s32.totalorder %s662_s23, 4   ;;  %s846_s12 = smov %s581_s13 }
 0x11c   : > { %s847_s13 = smov %s585_s14  ;;  %s848_s14 = smov %s698_s11 }
 0x11d   : > { %s849_s15 = smov %s662_s23  ;;  %19 = sbr.rel (!%p17_p10) target bundleno = 6 (0x6), region = 81 }
 0x124   :  { %322 = vsyncpa [#allocation3], 1 }
 0x125   :  { %324 = vsyncpa [#allocation3 + $0x1], 1 }
 0x126   :  { %325 = vsyncpa [#allocation6], 1 }
 0x127   :  { %326 = vsyncpa [#allocation4], 1 }
 0x128   :  { %328 = vsyncpa [#allocation4 + $0x1], 1 }

</bundles_post_ra>
